<compile_context>
chip_gen: v6e
topology: v6e:2x2x1
jax: 0.10.0
libtpu: 0.0.40
codegen_flags: <defaults>
</compile_context>

<pallas_src>
import math

import jax
import jax.numpy as jnp
from jax.experimental import pallas as pl
from jax.experimental.pallas import tpu as pltpu


# Lane widths to try for the 2D view of the flat buffer (multiples of 128).
_PREFERRED_LANE_WIDTHS = (1024, 2048, 4096, 8192, 512, 384, 256, 128)

_N_SLOTS = 8                          # max outstanding DMA chunks
_TARGET_CHUNK_BYTES = 8 * 1024 * 1024  # ~8 MiB per DMA chunk
_MAX_CHUNKS = 64                      # bound for the trace-time-unrolled loop


def _min_sublane(itemsize):
    # Minimum sublane tile per dtype packing: 8 (4B), 16 (2B), 32 (1B).
    return max(8, 32 // max(int(itemsize), 1))


def _pallas_identity_copy(x2d, *, target_chunk_bytes=_TARGET_CHUNK_BYTES,
                          max_chunks=_MAX_CHUNKS):
    """Identity copy of a 2D array via chunked HBM->HBM DMA (no VMEM staging)."""
    rows, lane = x2d.shape
    itemsize = jnp.dtype(x2d.dtype).itemsize
    sub = _min_sublane(itemsize)
    row_bytes = max(lane * itemsize, 1)
    total_bytes = rows * row_bytes

    # Pick a sublane-aligned chunk height targeting ~target_chunk_bytes, with
    # at most `max_chunks` chunks (the copy loop is unrolled at trace time).
    chunk_rows = max(1, target_chunk_bytes // row_bytes)
    chunk_rows = max(sub, (chunk_rows // sub) * sub)
    min_rows_for_cap = pl.cdiv(rows, max_chunks)
    if chunk_rows < min_rows_for_cap:
        chunk_rows = pl.cdiv(min_rows_for_cap, sub) * sub
    chunk_rows = min(chunk_rows, rows)
    n_chunks = pl.cdiv(rows, chunk_rows)

    def kernel(x_hbm, o_hbm, sems):
        if n_chunks == 1:
            # Whole-array copy, single DMA.
            cp = pltpu.make_async_copy(x_hbm, o_hbm, sems.at[0])
            cp.start()
            cp.wait()
            return
        copies = []
        for i in range(n_chunks):
            start = i * chunk_rows
            size = min(chunk_rows, rows - start)   # last chunk may be ragged
            cp = pltpu.make_async_copy(
                x_hbm.at[pl.ds(start, size), :],
                o_hbm.at[pl.ds(start, size), :],
                sems.at[i % _N_SLOTS])
            if i >= _N_SLOTS:
                # Free this slot's semaphore before reusing it.
                copies[i - _N_SLOTS].wait()
            cp.start()
            copies.append(cp)
        # Drain the remaining in-flight copies.
        for cp in copies[max(0, n_chunks - _N_SLOTS):]:
            cp.wait()

    return pl.pallas_call(
        kernel,
        out_shape=jax.ShapeDtypeStruct((rows, lane), x2d.dtype),
        in_specs=[pl.BlockSpec(memory_space=pl.ANY)],
        out_specs=pl.BlockSpec(memory_space=pl.ANY),
        scratch_shapes=[pltpu.SemaphoreType.DMA((_N_SLOTS,))],
        cost_estimate=pl.CostEstimate(
            flops=0, transcendentals=0, bytes_accessed=2 * total_bytes),
    )(x2d)


def reshape_forward(x, target_shape, *, donate=False):
    """Equivalent of Reshape(*target_shape).forward(x)."""
    bs = x.shape[0]
    flat_len = math.prod(x.shape[1:])
    tgt_len = math.prod(target_shape)
    assert flat_len == tgt_len, (
        f"cannot reshape {x.shape[1:]} (={flat_len}) into {target_shape} (={tgt_len})"
    )

    if donate:
        # Caller guarantees x's buffer is donated / dead after this call:
        # reshape is pure metadata, a copy would only add HBM traffic.
        return x.reshape(bs, *target_shape)

    total = bs * flat_len

    # Lane-dense 2D view of the whole (row-major contiguous) buffer.
    lane = None
    for cand in _PREFERRED_LANE_WIDTHS:
        if total % cand == 0:
            lane = cand
            break

    if lane is None:
        # Odd totals: keep a full-extent last dim; row-chunked DMA still applies
        # and nothing has to fit in VMEM.
        x2d = x.reshape(bs, flat_len)
    else:
        x2d = x.reshape(total // lane, lane)

    out2d = _pallas_identity_copy(x2d)

    # Final metadata reshape to (bs, *target_shape).
    return out2d.reshape(bs, *target_shape)


class Reshape:
    """JAX/Pallas mirror of the PyTorch Reshape module (no parameters)."""

    def __init__(self, *shape):
        self.shape = shape

    def __call__(self, x, *, donate=False):
        return reshape_forward(x, self.shape, donate=donate)


if __name__ == "__main__":
    key = jax.random.PRNGKey(0)
    k1, k2, k3 = jax.random.split(key, 3)

    # 1) Main example: NCHW-style input (2, 4, 16, 16) -> Reshape(8, 128).
    x = jax.random.normal(k1, (2, 4, 16, 16), dtype=jnp.float32)
    module = Reshape(8, 128)
    out = jax.block_until_ready(module(x))
    expected = x.reshape(x.shape[0], 8, 128)
    assert out.shape == (2, 8, 128), out.shape
    assert out.dtype == x.dtype
    assert bool(jnp.all(out == expected))

    # 2) Odd-total fallback path (element count not a multiple of 128).
    x_odd = jax.random.normal(k2, (2, 3, 5, 7), dtype=jnp.float32)
    out_odd = jax.block_until_ready(Reshape(105)(x_odd))
    assert bool(jnp.all(out_odd == x_odd.reshape(2, 105)))

    # 3) Multi-chunk DMA path exercised at a small size (tiny chunk target so
    #    the slot-reuse / drain logic runs: 128 rows, 8-row chunks, 16 chunks).
    x_mc = jax.random.normal(k3, (128, 128), dtype=jnp.float32)
    out_mc = jax.block_until_ready(
        _pallas_identity_copy(x_mc, target_chunk_bytes=4096))
    assert bool(jnp.all(out_mc == x_mc))

    print("KERNEL_OK")
</pallas_src>

<mosaic_0001>
module attributes {stable_mosaic.version = 11 : i64} {
  func.func @kernel(%arg0: memref<2x1024xf32, #tpu.memory_space<any>>, %arg1: memref<2x1024xf32, #tpu.memory_space<any>>, %arg2: memref<8x!tpu.dma_semaphore, #tpu.memory_space<semaphore_mem>>) attributes {dimension_semantics = [], scalar_prefetch = 0 : i64, scratch_operands = 1 : i64, tpu.core_type = #tpu.core_type<tc>} {
    %c0_i32 = arith.constant 0 : i32
    %0 = tpu.memref_slice %arg2[%c0_i32] : memref<8x!tpu.dma_semaphore, #tpu.memory_space<semaphore_mem>> -> memref<1x!tpu.dma_semaphore, #tpu.memory_space<semaphore_mem>>
    %1 = tpu.memref_squeeze %0 : memref<1x!tpu.dma_semaphore, #tpu.memory_space<semaphore_mem>> -> memref<!tpu.dma_semaphore, #tpu.memory_space<semaphore_mem>>
    tpu.enqueue_dma source(%arg0 : memref<2x1024xf32, #tpu.memory_space<any>>) target(%arg1 : memref<2x1024xf32, #tpu.memory_space<any>>) target_semaphore(%1 : memref<!tpu.dma_semaphore, #tpu.memory_space<semaphore_mem>>)
    %c0_i32_0 = arith.constant 0 : i32
    %2 = tpu.memref_slice %arg2[%c0_i32_0] : memref<8x!tpu.dma_semaphore, #tpu.memory_space<semaphore_mem>> -> memref<1x!tpu.dma_semaphore, #tpu.memory_space<semaphore_mem>>
    %3 = tpu.memref_squeeze %2 : memref<1x!tpu.dma_semaphore, #tpu.memory_space<semaphore_mem>> -> memref<!tpu.dma_semaphore, #tpu.memory_space<semaphore_mem>>
    tpu.wait_dma2 semaphore(%3 : memref<!tpu.dma_semaphore, #tpu.memory_space<semaphore_mem>>) src(%arg0 : memref<2x1024xf32, #tpu.memory_space<any>>) dst(%arg1 : memref<2x1024xf32, #tpu.memory_space<any>>)
    return
  }
}

</mosaic_0001>

<bundles_post_ra>
// kernel: tpu_custom_call.1
= control target key start
LH: loop header
LB: loop body
LE: loop exit
PB: predicated region body
PF: predicated region fallthrough
CT: control target
= control target key end

     0   :  { %s85_s6 = smov [#allocation2]   ;;  %s86_s7 = smov 131072   ;;  %s104_s0 = inlined_call_operand.hbm [shape: f32[2,1024], index: 0, kind: input, shape index: {}]   ;;  %s105_s1 = inlined_call_operand.hbm [shape: f32[2,1024], index: 1, kind: output, shape index: {}]  }
   0x1   :  { %s87_s8 = smov 0  }
   0x2   :  { %12 = dma.general %s104_s0, 256, %s105_s1, %s85_s6, %s86_s7, [#allocation4], %s87_s8, 0  }
   0x3   :  { %83 = dma.done.wait [#allocation2], 256 }
   0x4   :  { %84 = vsyncadd [#allocation2], 4294967040 }
   0x5   :  { %17 = vsyncmov [#allocation2] }
   0x8   :  { %s18_s13 = vpop.sfrf %17 }
   0x9   :  { %p72_p0 = scmp.ne.s32.totalorder %s18_s13, 0 }
   0xb   :  { %22 = shalt.err (%p72_p0)  }
   0xc   :  { %24 = vsyncmov [#allocation2 + $0x1] }
   0xf   :  { %s25_s14 = vpop.sfrf %24 }
  0x10   :  { %p73_p1 = scmp.ne.s32.totalorder %s25_s14, 0 }
  0x12   :  { %29 = shalt.err (%p73_p1)  }
  0x13   :  { %31 = vsyncmov [#allocation2 + $0x2] }
  0x16   :  { %s32_s15 = vpop.sfrf %31 }
  0x17   :  { %p74_p2 = scmp.ne.s32.totalorder %s32_s15, 0 }
  0x19   :  { %36 = shalt.err (%p74_p2)  }
  0x1a   :  { %38 = vsyncmov [#allocation2 + $0x3] }
  0x1d   :  { %s39_s16 = vpop.sfrf %38 }
  0x1e   :  { %p75_p3 = scmp.ne.s32.totalorder %s39_s16, 0 }
  0x20   :  { %43 = shalt.err (%p75_p3)  }
  0x21   :  { %45 = vsyncmov [#allocation2 + $0x4] }
  0x24   :  { %s46_s0 = vpop.sfrf %45 }
  0x25   :  { %p76_p4 = scmp.ne.s32.totalorder %s46_s0, 0 }
  0x27   :  { %50 = shalt.err (%p76_p4)  }
  0x28   :  { %52 = vsyncmov [#allocation2 + $0x5] }
  0x2b   :  { %s53_s1 = vpop.sfrf %52 }
  0x2c   :  { %p77_p5 = scmp.ne.s32.totalorder %s53_s1, 0 }
  0x2e   :  { %57 = shalt.err (%p77_p5)  }
  0x2f   :  { %59 = vsyncmov [#allocation2 + $0x6] }
  0x32   :  { %s60_s17 = vpop.sfrf %59 }
  0x33   :  { %p78_p6 = scmp.ne.s32.totalorder %s60_s17, 0 }
  0x35   :  { %64 = shalt.err (%p78_p6)  }
  0x36   :  { %66 = vsyncmov [#allocation2 + $0x7] }
  0x39   :  { %s67_s18 = vpop.sfrf %66 }
  0x3a   :  { %p79_p7 = scmp.ne.s32.totalorder %s67_s18, 0 }
  0x3c   :  { %71 = shalt.err (%p79_p7)  }

</bundles_post_ra>
